<compile_context>
chip_gen: v6e
topology: v6e:2x2x1
jax: 0.10.0
libtpu: 0.0.40
codegen_flags: <defaults>
</compile_context>

<pallas_src>
import functools

import jax
import jax.numpy as jnp
from jax import lax
from jax.experimental import pallas as pl
from jax.experimental.pallas import tpu as pltpu

NUM_FEATURES = 5
EPS = 1e-5  # torch.nn.InstanceNorm2d default


# ----------------------------- helpers --------------------------------------


def _cdiv(a, b):
    return -(-a // b)


def _round_up(a, b):
    return _cdiv(a, b) * b


def _sublane_multiple(dtype):
    # rows per sublane tile: f32 -> 8, bf16 -> 16, int8/fp8 -> 32.
    return max(8, 32 // jnp.dtype(dtype).itemsize)


def _vmem_limits():
    """(scoped vmem limit, per-block byte budget), generation-aware."""
    try:
        cap = int(pltpu.get_tpu_info().vmem_capacity_bytes)
    except Exception:
        cap = 64 * 1024 * 1024  # conservative default (v7x physical VMEM)
    # 32 MiB scoped limit on v7x (64 MiB physical), 48 MiB on v5e/v6e (128 MiB).
    vmem_limit = min(cap // 2, 48 * 1024 * 1024)
    # Double-buffered in + out = 4 blocks; keep 25% headroom for compiler
    # scratch.  Lands at ~6 MiB blocks on v7x, 8 MiB on v5e/v6e.
    block_budget = min((vmem_limit * 3 // 4) // 4, 8 * 1024 * 1024)
    return vmem_limit, block_budget


# ----------------------------- kernels --------------------------------------


def _fused_kernel(x_ref, o_ref, *, inv_hw, n_pad):
    """Whole H*W row in the block: two-pass stats + normalize in one sweep."""
    x = x_ref[...].astype(jnp.float32)
    mean = jnp.sum(x, axis=-1, keepdims=True) * inv_hw
    xc = x - mean
    ssq = jnp.sum(xc * xc, axis=-1, keepdims=True)
    if n_pad:
        # Zero-padded lanes each contributed exactly mean^2 to ssq; remove it.
        ssq = ssq - jnp.float32(n_pad) * (mean * mean)
    var = jnp.maximum(ssq * inv_hw, 0.0)
    # rsqrt goes to the EUP slot (free); kernel stays HBM-bound.
    o_ref[...] = (xc * lax.rsqrt(var + EPS)).astype(o_ref.dtype)


def _stats_kernel(x_ref, mean_ref, rstd_ref, s_ref, s2_ref, *, inv_hw):
    """Split path pass 1: accumulate per-row (sum, sumsq) across the hw axis."""
    j = pl.program_id(1)

    @pl.when(j == 0)
    def _():
        s_ref[...] = jnp.zeros_like(s_ref)
        s2_ref[...] = jnp.zeros_like(s2_ref)

    x = x_ref[...].astype(jnp.float32)
    s_ref[...] += jnp.sum(x, axis=-1, keepdims=True)
    s2_ref[...] += jnp.sum(x * x, axis=-1, keepdims=True)

    @pl.when(j == pl.num_programs(1) - 1)
    def _():
        # One-pass E[x^2]-E[x]^2 with a non-negativity guard; zero pads along
        # the lane axis are exact no-ops for both accumulators.
        mean = s_ref[...] * inv_hw
        var = jnp.maximum(s2_ref[...] * inv_hw - mean * mean, 0.0)
        mean_ref[...] = mean
        rstd_ref[...] = lax.rsqrt(var + EPS)


def _apply_kernel(x_ref, mean_ref, rstd_ref, o_ref):
    """Split path pass 2: elementwise normalize with per-row mean / rstd."""
    x = x_ref[...].astype(jnp.float32)
    o_ref[...] = ((x - mean_ref[...]) * rstd_ref[...]).astype(o_ref.dtype)


# ----------------------------- wrappers -------------------------------------


def _fused_path(x2d, rows, hw, hw_lane, sub, block_budget, vmem_limit):
    itemsize = x2d.dtype.itemsize
    n_pad = hw_lane - hw
    if n_pad:
        x2d = jnp.pad(x2d, ((0, 0), (0, n_pad)))  # zeros: corrected in-kernel

    row_bytes = hw_lane * itemsize
    rows_padded = _round_up(rows, sub)
    tr = max(sub, (block_budget // row_bytes) // sub * sub)
    tr = min(tr, rows_padded)
    if rows_padded >= 2 * sub:
        # Keep >=2 grid steps so "parallel" can shard rows over v7x's 2 TCs.
        tr = min(tr, _round_up(_cdiv(rows_padded, 2), sub))
    grid = (_cdiv(rows, tr),)

    kernel = functools.partial(_fused_kernel, inv_hw=1.0 / hw, n_pad=n_pad)
    out = pl.pallas_call(
        kernel,
        out_shape=jax.ShapeDtypeStruct((rows, hw_lane), x2d.dtype),
        grid_spec=pltpu.PrefetchScalarGridSpec(
            num_scalar_prefetch=0,
            grid=grid,
            in_specs=[pl.BlockSpec((tr, hw_lane), lambda i: (i, 0))],
            out_specs=pl.BlockSpec((tr, hw_lane), lambda i: (i, 0)),
        ),
        compiler_params=pltpu.CompilerParams(
            dimension_semantics=("parallel",),
            vmem_limit_bytes=vmem_limit,
        ),
        cost_estimate=pl.CostEstimate(
            flops=6 * rows * hw,
            transcendentals=rows,
            bytes_accessed=2 * rows * hw_lane * itemsize,
        ),
    )(x2d)
    return out[:, :hw] if n_pad else out


def _split_path(x2d, rows, hw, sub, block_budget, vmem_limit):
    itemsize = x2d.dtype.itemsize
    # Lane tile: largest multiple of 128 such that a (sub, thw) block fits.
    thw = max(128, (block_budget // (sub * itemsize)) // 128 * 128)
    thw = min(thw, _round_up(hw, 128))
    hw_pad = _round_up(hw, thw)
    n_pad = hw_pad - hw
    if n_pad:
        x2d = jnp.pad(x2d, ((0, 0), (0, n_pad)))  # zeros: exact for sum/sumsq

    rows_padded = _round_up(rows, sub)
    tr = max(sub, (block_budget // (thw * itemsize)) // sub * sub)
    tr = min(tr, rows_padded)
    n_r = _cdiv(rows, tr)
    n_h = hw_pad // thw
    inv_hw = 1.0 / hw

    # Pass 1: per-row mean / rstd.
    mean, rstd = pl.pallas_call(
        functools.partial(_stats_kernel, inv_hw=inv_hw),
        out_shape=(jax.ShapeDtypeStruct((rows, 1), jnp.float32),
                   jax.ShapeDtypeStruct((rows, 1), jnp.float32)),
        grid_spec=pltpu.PrefetchScalarGridSpec(
            num_scalar_prefetch=0,
            grid=(n_r, n_h),
            in_specs=[pl.BlockSpec((tr, thw), lambda i, j: (i, j))],
            out_specs=[pl.BlockSpec((tr, 1), lambda i, j: (i, 0)),
                       pl.BlockSpec((tr, 1), lambda i, j: (i, 0))],
            scratch_shapes=[pltpu.VMEM((tr, 1), jnp.float32),
                            pltpu.VMEM((tr, 1), jnp.float32)],
        ),
        compiler_params=pltpu.CompilerParams(
            dimension_semantics=("parallel", "arbitrary"),
            vmem_limit_bytes=vmem_limit,
        ),
        cost_estimate=pl.CostEstimate(
            flops=3 * rows * hw,
            transcendentals=rows,
            bytes_accessed=rows * hw_pad * itemsize,
        ),
    )(x2d)

    # Pass 2: normalize.
    out = pl.pallas_call(
        _apply_kernel,
        out_shape=jax.ShapeDtypeStruct((rows, hw_pad), x2d.dtype),
        grid_spec=pltpu.PrefetchScalarGridSpec(
            num_scalar_prefetch=0,
            grid=(n_r, n_h),
            in_specs=[pl.BlockSpec((tr, thw), lambda i, j: (i, j)),
                      pl.BlockSpec((tr, 1), lambda i, j: (i, 0)),
                      pl.BlockSpec((tr, 1), lambda i, j: (i, 0))],
            out_specs=pl.BlockSpec((tr, thw), lambda i, j: (i, j)),
        ),
        compiler_params=pltpu.CompilerParams(
            dimension_semantics=("parallel", "parallel"),
            vmem_limit_bytes=vmem_limit,
        ),
        cost_estimate=pl.CostEstimate(
            flops=2 * rows * hw,
            transcendentals=0,
            bytes_accessed=2 * rows * hw_pad * itemsize,
        ),
    )(x2d, mean, rstd)

    return out[:, :hw] if n_pad else out


def instance_norm2d(x, *, max_block_bytes=None):
    """Forward of torch.nn.InstanceNorm2d(C) defaults
    (affine=False, track_running_stats=False, eps=1e-5)."""
    N, C, H, W = x.shape
    rows, hw = N * C, H * W
    itemsize = x.dtype.itemsize
    sub = _sublane_multiple(x.dtype)

    vmem_limit, block_budget = _vmem_limits()
    if max_block_bytes is not None:
        block_budget = min(block_budget, max_block_bytes)

    x2d = x.reshape(rows, hw)
    hw_lane = _round_up(hw, 128)  # lane-dense blocks (no masked vst)

    if sub * hw_lane * itemsize <= block_budget:
        out2d = _fused_path(x2d, rows, hw, hw_lane, sub, block_budget, vmem_limit)
    else:
        out2d = _split_path(x2d, rows, hw, sub, block_budget, vmem_limit)
    return out2d.reshape(N, C, H, W)


# ----------------------------- demo / check ---------------------------------


if __name__ == "__main__":
    def ref_instance_norm(x):
        mean = jnp.mean(x, axis=(2, 3), keepdims=True)
        var = jnp.mean((x - mean) ** 2, axis=(2, 3), keepdims=True)
        return (x - mean) / jnp.sqrt(var + EPS)

    key = jax.random.PRNGKey(0)
    # NCHW input consistent with InstanceNorm2d(NUM_FEATURES=5): (2, 5, 16, 16)
    x = jax.random.normal(key, (2, NUM_FEATURES, 16, 16), dtype=jnp.float32)

    out = instance_norm2d(x)
    jax.block_until_ready(out)
    assert out.shape == x.shape and out.dtype == x.dtype
    assert jnp.max(jnp.abs(out - ref_instance_norm(x))) < 2e-5

    # Exercise the large-H*W split path (stats accumulation + apply) by forcing
    # a tiny block budget, so both code paths stay validated.
    out_split = instance_norm2d(x, max_block_bytes=4096)
    jax.block_until_ready(out_split)
    assert jnp.max(jnp.abs(out_split - ref_instance_norm(x))) < 2e-5

    # Exercise the non-128-multiple H*W (lane padding) path: 14*14 = 196 lanes.
    x2 = jax.random.normal(jax.random.PRNGKey(1), (2, NUM_FEATURES, 14, 14),
                           dtype=jnp.float32)
    out2 = instance_norm2d(x2)
    jax.block_until_ready(out2)
    assert jnp.max(jnp.abs(out2 - ref_instance_norm(x2))) < 2e-5

    print("KERNEL_OK")
</pallas_src>

<mosaic_0001>
module attributes {stable_mosaic.version = 11 : i64} {
  func.func @_fused_kernel(%arg0: i32, %arg1: memref<8x256xf32, #tpu.memory_space<vmem>>, %arg2: memref<8x256xf32, #tpu.memory_space<vmem>>) attributes {dimension_semantics = [#tpu.dimension_semantics<parallel>], iteration_bounds = array<i64: 2>, scalar_prefetch = 0 : i64, scratch_operands = 0 : i64, tpu.core_type = #tpu.core_type<tc>, window_params = [{transform_indices = @transform_0, window_bounds = array<i64: 8, 256>}, {transform_indices = @transform_1, window_bounds = array<i64: 8, 256>}]} {
    %c0 = arith.constant 0 : index
    %c0_0 = arith.constant 0 : index
    %0 = vector.load %arg1[%c0, %c0_0] : memref<8x256xf32, #tpu.memory_space<vmem>>, vector<8x256xf32>
    %cst = arith.constant dense<0.000000e+00> : vector<8xf32>
    %1 = vector.multi_reduction <add>, %0, %cst [1] : vector<8x256xf32> to vector<8xf32>
    %2 = vector.shape_cast %1 : vector<8xf32> to vector<8x1xf32>
    %cst_1 = arith.constant 3.906250e-03 : f32
    %3 = vector.broadcast %cst_1 : f32 to vector<8x1xf32>
    %4 = arith.mulf %2, %3 : vector<8x1xf32>
    %5 = vector.broadcast %4 : vector<8x1xf32> to vector<8x256xf32>
    %6 = arith.subf %0, %5 : vector<8x256xf32>
    %7 = arith.mulf %6, %6 : vector<8x256xf32>
    %cst_2 = arith.constant dense<0.000000e+00> : vector<8xf32>
    %8 = vector.multi_reduction <add>, %7, %cst_2 [1] : vector<8x256xf32> to vector<8xf32>
    %9 = vector.shape_cast %8 : vector<8xf32> to vector<8x1xf32>
    %cst_3 = arith.constant 3.906250e-03 : f32
    %10 = vector.broadcast %cst_3 : f32 to vector<8x1xf32>
    %11 = arith.mulf %9, %10 : vector<8x1xf32>
    %cst_4 = arith.constant 0.000000e+00 : f32
    %12 = vector.broadcast %cst_4 : f32 to vector<8x1xf32>
    %13 = arith.maximumf %11, %12 : vector<8x1xf32>
    %cst_5 = arith.constant 9.99999974E-6 : f32
    %14 = vector.broadcast %cst_5 : f32 to vector<8x1xf32>
    %15 = arith.addf %13, %14 : vector<8x1xf32>
    %16 = math.rsqrt %15 : vector<8x1xf32>
    %17 = vector.broadcast %16 : vector<8x1xf32> to vector<8x256xf32>
    %18 = arith.mulf %6, %17 : vector<8x256xf32>
    %c0_6 = arith.constant 0 : index
    %c0_7 = arith.constant 0 : index
    %19 = vector.load %arg2[%c0_6, %c0_7] : memref<8x256xf32, #tpu.memory_space<vmem>>, vector<8x256xf32>
    tpu.vector_store %arg2[%c0_6, %c0_7], %18 {strides = array<i32>} : memref<8x256xf32, #tpu.memory_space<vmem>>, vector<8x256xf32>,
    return
  }
  func.func @transform_0(%arg0: i32) -> (i32, i32) {
    %c0_i32 = arith.constant 0 : i32
    %c0_i32_0 = arith.constant 0 : i32
    return %arg0, %c0_i32 : i32, i32
  }
  func.func @transform_1(%arg0: i32) -> (i32, i32) {
    %c0_i32 = arith.constant 0 : i32
    %c0_i32_0 = arith.constant 0 : i32
    return %arg0, %c0_i32 : i32, i32
  }
}

</mosaic_0001>

<bundles_post_ra>
// kernel: tpu_custom_call.1
= control target key start
LH: loop header
LB: loop body
LE: loop exit
PB: predicated region body
PF: predicated region fallthrough
CT: control target
= control target key end

     0   :  { %6 = vsyncpa [#allocation3], 0  ;;  %s556_s0 = inlined_call_operand.hbm [shape: f32[10,256], index: 0, kind: input, shape index: {}]   ;;  %s557_s1 = inlined_call_operand.hbm [shape: f32[10,256], index: 1, kind: output, shape index: {}]  }
   0x1   :  { %8 = vsyncpa [#allocation3 + $0x1], 0 }
   0x2   :  { %9 = vsyncpa [#allocation4], 0 }
   0x3   :  { %11 = vsyncpa [#allocation4 + $0x1], 0  ;;  %s409_s6 = smov 0   ;;  %s411_s7 = smov 0  }
   0x4   :  { %s413_s8 = smov 0   ;;  %s415_s9 = smov 0  }
   0x5 LB: > { %s430_s10 = sadd.s32 4294967295, %s395_s9   ;;  %s239_s11 = sadd.s32 4294967294, %s395_s9   ;;  %s395_s9 = sphi %s415_s9, %s574_s9   ;;  %s391_s8 = sphi %s413_s8, %s573_s8   ;;  %s387_s7 = sphi %s411_s7, %s572_s7   ;;  %s383_s6 = sphi %s409_s6, %s571_s6  }
   0x6   : > { %s434_s12 = sadd.s32 1, %s395_s9   ;;  %s24_s13 = sadd.s32 1, %s391_s8 }
   0x7   : > { %s21_s14 = ssub.s32 %s395_s9, %s434_s12  ;;  %p31_p0 = scmp.ne.s32.totalorder %s391_s8, %s387_s7 }
   0x8   : > { %p22_p1 = scmp.eq.s32.totalorder %s21_s14, 0  ;;  %p32_p2 = scmp.eq.s32.totalorder %s395_s9, 0 }
   0x9   : > { %p37_p3 = scmp.ne.s32.totalorder %s387_s7, %s383_s6  ;;  %p38_p4 = scmp.eq.s32.totalorder %s430_s10, 0 }
   0xa   : > { %s446_s15 = scalar_select %p22_p1, %s391_s8, %s24_s13  }
   0xb   : > { %p448_p5 = por %p32_p2, %p31_p0  ;;  %p452_p6 = por %p38_p4, %p37_p3 }
   0xc   : > { %p61_p7 = scmp.eq.s32.totalorder %s430_s10, 1  ;;  %p67_p8 = scmp.eq.s32.totalorder %s239_s11, 1 }
   0xd   : > { %s561_s17 = scalar_select %p452_p6, 1, 0 }
   0xe   : > { %p267_p10 = scmp.lt.s32.totalorder %s395_s9, 2  ;;  %p459_p11 = por %p61_p7, %p31_p0 }
   0xf   : > { %p463_p12 = por %p67_p8, %p37_p3  ;;  %s87_s20 = sand.u32 1, %s391_s8  }
  0x10   : > { %s562_s18 = scalar_select %p459_p11, 1, 0 }
  0x11   : > { %s563_s19 = scalar_select %p463_p12, 1, 0 }
  0x12   : > { %s253_s21 = sshll.u32 %s395_s9, 8  ;;  %s242_s22 = sshll.u32 %s87_s20, 4 }
  0x13   : > { %s472_s25 = scalar_lea.hbm %s556_s0, %s253_s21  ;;  %s91_s26 = scalar_lea.vmem [#allocation2], %s242_s22 }
  0x14   : > { %s99_s27 = sshll.u32 %s91_s26, 4  ;;  %p476_p13 = pnand %p267_p10, %p448_p5  ;;  %s480_s27 = int_to_ptr.vmem [resolvable:$true] %s99_s27 }
  0x15   : > { %s88_s29 = scalar_lea.sflag [#allocation3], %s87_s20  ;;  %s303_s30 = scalar_lea.hbm %s472_s25, 256 }
  0x16   : > { %p304_p2 = scmp.ne.s32.totalorder %s472_s25, %s303_s30  ;;  %p305_p3 = pneg %p476_p13 }
  0x17   : > { %s308_s4 = scalar_lea.hbm %s556_s0, 512  ;;  %p309_p5 = scmp.lt.s32.totalorder %s472_s25, %s556_s0 }
  0x18   : > { %p306_p4 = pnand %p305_p3, %p304_p2  ;;  %p310_p8 = scmp.lt.s32.totalorder %s308_s4, %s303_s30 }
  0x1a   : > { %p307_p7 = pneg %p306_p4  ;;  %p311_p10 = por %p310_p8, %p309_p5 }
  0x1c   : > { %p312_p9 = pnand %p311_p10, %p307_p7 }
  0x1e   : > { %315 = shalt.err (!%p312_p9)
}
  0x1f   : > { %s316_s13 = scalar_lea.vmem %s480_s27, 256  ;;  %s397_s14 = smov [#allocation2]  }
  0x20   : > { %p317_p0 = scmp.ne.s32.totalorder %s480_s27, %s316_s13  ;;  %s321_s16 = sshll.u32 %s397_s14, 4  ;;  %s322_s16 = int_to_ptr.vmem [resolvable:$false] %s321_s16 }
  0x21   : > { %s323_s20 = scalar_lea.vmem %s322_s16, 512  ;;  %p324_p4 = scmp.lt.s32.totalorder %s480_s27, %s322_s16 }
  0x22   : > { %p319_p1 = pnand %p317_p0, %p305_p3  ;;  %p325_p12 = scmp.lt.s32.totalorder %s323_s20, %s316_s13 }
  0x24   : > { %p320_p2 = pneg %p319_p1  ;;  %p326_p11 = por %p325_p12, %p324_p4 }
  0x26   : > { %p327_p6 = pnand %p326_p11, %p320_p2 }
  0x28   : > { %330 = shalt.err (!%p327_p6)
}
  0x29   : > { %262 = dma.hbm_to_vmem [thread:$0]  (!%p476_p13), %s472_s25, 256, %s480_s27, %s88_s29  }
  0x2a   : > { %p565_p9 = scmp.lt.s32.totalorder %s395_s9, 3  ;;  %p566_p7 = scmp.ge.s32.totalorder %s395_s9, 1 }
  0x2c   : > { %p105_p0 = pnand %p566_p7, %p565_p9 }
  0x2d   : > { %s507_s21 = sand.u32 (!%p105_p0), 1, %s387_s7   ;;  %p567_p6 = scmp.ne.s32.totalorder (!%p105_p0), %s561_s17, 0 }
  0x2e   : > { %108 = sbr.rel (%p105_p0) target bundleno = 374 (0x176), region = 24  ;;  %s246_s22 = sshll.u32 (!%p105_p0), %s507_s21, 4 }
  0x2f   : > { %s111_s23 = scalar_lea.sflag (!%p105_p0), [#allocation3], %s507_s21  ;;  %s114_s24 = scalar_lea.vmem (!%p105_p0), [#allocation2], %s246_s22 }
  0x33   : > { %374 = dma.done.wait (%p567_p6), %s111_s23, 256  }
  0x34   : > { %376 = vsyncadd (%p567_p6), %s111_s23, 4294967040  ;;  %v133_v0 = vld [vmem:[%s114_s24] sm:$0xff]  ;;  %v134_v1 = vld [vmem:[%s114_s24 + $0x8] sm:$0xff]  ;;  %s254_s17 = sshll.u32 %s430_s10, 8  ;;  %s132_s25 = scalar_lea.vmem [#allocation5], %s246_s22 }
  0x35   : > { %v135_v2 = vadd.f32 %v134_v1, %v133_v0  ;;  %s169_s26 = sshll.u32 %s132_s25, 4  ;;  %s519_s29 = scalar_lea.hbm %s557_s1, %s254_s17  ;;  %s170_s26 = int_to_ptr.vmem [resolvable:$true] %s169_s26 }
  0x36   : > { %s155_s30 = scalar_lea.sflag [#allocation4], %s507_s21  ;;  %s331_s2 = scalar_lea.vmem %s170_s26, 256 }
  0x37   : > { %136 = vadd.xlane.f32.xlu0 %v135_v2  ;;  %p332_p11 = scmp.ne.s32.totalorder %s170_s26, %s331_s2  ;;  %p568_p12 = scmp.ne.s32.totalorder %s562_s18, 0 }
  0x38   : > { %s398_s10 = smov [#allocation5]  }
  0x39   : > { %p333_p13 = pnand %p332_p11, %p568_p12  ;;  %s335_s3 = sshll.u32 %s398_s10, 4  ;;  %s336_s3 = int_to_ptr.vmem [resolvable:$false] %s335_s3 }
  0x3a   : > { %s337_s4 = scalar_lea.vmem %s336_s3, 512  ;;  %p338_p3 = scmp.lt.s32.totalorder %s170_s26, %s336_s3 }
  0x3b   : > { %p334_p1 = pneg %p333_p13  ;;  %p339_p5 = scmp.lt.s32.totalorder %s337_s4, %s331_s2 }
  0x3d   : > { %p340_p8 = por %p339_p5, %p338_p3 }
  0x3f   : > { %p341_p10 = pnand %p340_p8, %p334_p1 }
  0xc0   : > { %v137_v3 = vpop.xlane.xlu0 %136 }
  0xc1   : > { %v138_v4 = vmul.f32 0.00390625, %v137_v3 }
  0xc3   : > { %v139_v5 = vsub.f32 %v133_v0, %v138_v4  ;;  %v140_v6 = vsub.f32 %v134_v1, %v138_v4 }
  0xc5   : > { %v141_v7 = vmul.f32 %v139_v5, %v139_v5  ;;  %v142_v8 = vmul.f32 %v140_v6, %v140_v6 }
  0xc7   : > { %v143_v9 = vadd.f32 %v142_v8, %v141_v7 }
  0xc9   : > { %144 = vadd.xlane.f32.xlu0 %v143_v9 }
 0x152   : > { %v145_v10 = vpop.xlane.xlu0 %144 }
 0x153   : > { %v146_v11 = vmul.f32 0.00390625, %v145_v10 }
 0x155   : > { %v147_v12 = vmax.f32 %v146_v11, 0.0 }
 0x157   : > { %v148_v13 = vadd.f32 1e-05, %v147_v12 }
 0x159   : > { %301 = vrsqrt.f32 %v148_v13 }
 0x166   : > { %v302_v14 = vpop.eup %301 }
 0x167   : > { %v150_v15 = vmul.f32 %v302_v14, %v139_v5  ;;  %v151_v16 = vmul.f32 %v302_v14, %v140_v6 }
 0x169   : > { %152 = vst [vmem:[%s132_s25] sm:$0xff] %v150_v15  ;;  %153 = vst [vmem:[%s132_s25 + $0x8] sm:$0xff] %v151_v16 }
 0x16a   : > { %344 = shalt.err (!%p341_p10)
}
 0x16b   : > { %s345_s5 = scalar_lea.hbm %s519_s29, 256  ;;  %s349_s14 = scalar_lea.hbm %s557_s1, 512 }
 0x16c   : > { %p346_p2 = scmp.ne.s32.totalorder %s519_s29, %s345_s5  ;;  %p350_p7 = scmp.lt.s32.totalorder %s519_s29, %s557_s1 }
 0x16d   : > { %p351_p0 = scmp.lt.s32.totalorder %s349_s14, %s345_s5 }
 0x16e   : > { %p347_p4 = pnand %p346_p2, %p568_p12 }
 0x16f   : > { %p352_p6 = por %p351_p0, %p350_p7 }
 0x170   : > { %p348_p9 = pneg %p347_p4 }
 0x172   : > { %p353_p11 = pnand %p352_p6, %p348_p9 }
 0x174   : > { %356 = shalt.err (!%p353_p11)
}
 0x175   : > { %257 = dma.vmem_to_hbm [thread:$0]  (%p568_p12), %s170_s26, 256, %s519_s29, %s155_s30  }
 0x176 PF: > { %s181_s21 = sand.u32 1, %s383_s6   ;;  %p569_p13 = scmp.ne.s32.totalorder %s563_s19, 0 }
 0x177   : > { %p570_p1 = scmp.ge.s32.totalorder %s395_s9, 2  ;;  %s182_s22 = scalar_lea.sflag [#allocation4], %s181_s21 }
 0x179   : > { %p264_p3 = pnand %p570_p1, %p569_p13 }
 0x17b   : > { %p265_p5 = pneg %p264_p3 }
 0x17d   : > { %378 = dma.done.wait (%p265_p5), %s182_s22, 256  }
 0x17e   : > { %380 = vsyncadd (%p265_p5), %s182_s22, 4294967040  ;;  %p14_p8 = scmp.ge.s32.totalorder %s434_s12, 4   ;;  %s571_s6 = smov %s387_s7 }
 0x17f   : > { %s572_s7 = smov %s391_s8  ;;  %s573_s8 = smov %s446_s15 }
 0x180   : > { %s574_s9 = smov %s434_s12  ;;  %16 = sbr.rel (!%p14_p8) target bundleno = 5 (0x5), region = 69 }
 0x185   :  { %187 = vsyncpa [#allocation3], 1 }
 0x186   :  { %189 = vsyncpa [#allocation3 + $0x1], 1 }
 0x187   :  { %190 = vsyncpa [#allocation4], 1 }
 0x188   :  { %192 = vsyncpa [#allocation4 + $0x1], 1 }

</bundles_post_ra>
